<compile_context>
chip_gen: v7x
topology: tpu7x:2x2x1
jax: 0.10.0
libtpu: 0.0.40
codegen_flags: <defaults>
</compile_context>

<pallas_src>
import math

import jax
import jax.numpy as jnp
from jax.experimental import pallas as pl
from jax.experimental.pallas import tpu as pltpu


# ----------------------------------------------------------------------------
# "__init__": build the sinusoidal positional-encoding buffer (constant).
# ----------------------------------------------------------------------------
def make_positional_encoding(d_model, max_len=5000):
    position = jnp.arange(0.0, max_len, dtype=jnp.float32)[:, None]           # [max_len, 1]
    div_term = jnp.exp(
        jnp.arange(0.0, d_model, 2, dtype=jnp.float32) * -(math.log(10000.0) / d_model)
    )                                                                          # [d_model/2]
    angles = position * div_term                                               # [max_len, d_model/2]
    pe = jnp.zeros((max_len, d_model), jnp.float32)
    pe = pe.at[:, 0::2].set(jnp.sin(angles))
    pe = pe.at[:, 1::2].set(jnp.cos(angles))
    return pe[None, :, :]                                                      # [1, max_len, d_model]


# ----------------------------------------------------------------------------
# Pallas kernel: fused  out = x + pe_slice  (pe broadcast over batch).
# ----------------------------------------------------------------------------
def _pe_add_kernel(x_ref, pe_ref, o_ref):
    # x_ref: [B, L, D], pe_ref: [1, L, D] -> broadcast add over the batch dim.
    o_ref[...] = x_ref[...] + pe_ref[...]


def positional_encoding_forward(x, pe, start_indx, training=False):
    """Mirrors PositionalEncoding.forward (dropout = identity in eval mode)."""
    # TODO(synk): training-mode dropout (random masking + 1/(1-p) scaling) is
    # not implemented; eval-mode forward (identity dropout) is assumed.
    del training
    B, L, D = x.shape

    # Static slice of the constant buffer (start_indx and L are Python ints,
    # exactly like the PyTorch buffer indexing pe[:, start:start+L]).
    pe_slice = pe[:, start_indx:start_indx + L, :]                             # [1, L, D]

    return pl.pallas_call(
        _pe_add_kernel,
        out_shape=jax.ShapeDtypeStruct((B, L, D), x.dtype),
        grid=(1,),  # everything fits in VMEM -> single grid step, zero pipeline bubbles
        in_specs=[
            pl.BlockSpec((B, L, D), lambda i: (0, 0, 0)),
            pl.BlockSpec((1, L, D), lambda i: (0, 0, 0)),
        ],
        out_specs=pl.BlockSpec((B, L, D), lambda i: (0, 0, 0)),
        compiler_params=pltpu.CompilerParams(
            dimension_semantics=("arbitrary",),
        ),
    )(x, pe_slice)


# ----------------------------------------------------------------------------
# Pure-JAX reference (numerical sanity check)
# ----------------------------------------------------------------------------
def _ref_forward(x, pe, start_indx):
    L = x.shape[1]
    return x + pe[:, start_indx:start_indx + L, :]


# ----------------------------------------------------------------------------
# Driver
# ----------------------------------------------------------------------------
if __name__ == "__main__":
    B, L, D = 4, 16, 128        # batch, sequence length, d_model (lane-dense last dim)
    max_len = 64
    start_indx = 3
    dropout_p = 0.1             # eval mode -> identity

    key = jax.random.PRNGKey(0)
    x = jax.random.normal(key, (B, L, D), jnp.float32)

    pe = make_positional_encoding(D, max_len=max_len)   # constant buffer (as in __init__)

    out = positional_encoding_forward(x, pe, start_indx)
    out = jax.block_until_ready(out)

    ref = _ref_forward(x, pe, start_indx)
    assert out.shape == (B, L, D)
    assert jnp.allclose(out, ref, rtol=1e-6, atol=1e-6)

    print("KERNEL_OK")
</pallas_src>

<mosaic_0001>
module attributes {stable_mosaic.version = 11 : i64} {
  func.func @_pe_add_kernel(%arg0: i32, %arg1: memref<4x16x128xf32, #tpu.memory_space<vmem>>, %arg2: memref<1x16x128xf32, #tpu.memory_space<vmem>>, %arg3: memref<4x16x128xf32, #tpu.memory_space<vmem>>) attributes {dimension_semantics = [#tpu.dimension_semantics<arbitrary>], iteration_bounds = array<i64: 1>, scalar_prefetch = 0 : i64, scratch_operands = 0 : i64, tpu.core_type = #tpu.core_type<tc>, window_params = [{pipeline_mode = #tpu.pipeline_mode<synchronous>, transform_indices = @transform_0, window_bounds = array<i64: 4, 16, 128>}, {pipeline_mode = #tpu.pipeline_mode<synchronous>, transform_indices = @transform_1, window_bounds = array<i64: 1, 16, 128>}, {pipeline_mode = #tpu.pipeline_mode<synchronous>, transform_indices = @transform_2, window_bounds = array<i64: 4, 16, 128>}]} {
    %c0 = arith.constant 0 : index
    %c0_0 = arith.constant 0 : index
    %c0_1 = arith.constant 0 : index
    %0 = vector.load %arg1[%c0, %c0_0, %c0_1] : memref<4x16x128xf32, #tpu.memory_space<vmem>>, vector<4x16x128xf32>
    %c0_2 = arith.constant 0 : index
    %c0_3 = arith.constant 0 : index
    %c0_4 = arith.constant 0 : index
    %1 = vector.load %arg2[%c0_2, %c0_3, %c0_4] : memref<1x16x128xf32, #tpu.memory_space<vmem>>, vector<1x16x128xf32>
    %2 = vector.broadcast %1 : vector<1x16x128xf32> to vector<4x16x128xf32>
    %3 = arith.addf %0, %2 : vector<4x16x128xf32>
    %c0_5 = arith.constant 0 : index
    %c0_6 = arith.constant 0 : index
    %c0_7 = arith.constant 0 : index
    %4 = vector.load %arg3[%c0_5, %c0_6, %c0_7] : memref<4x16x128xf32, #tpu.memory_space<vmem>>, vector<4x16x128xf32>
    tpu.vector_store %arg3[%c0_5, %c0_6, %c0_7], %3 {strides = array<i32>} : memref<4x16x128xf32, #tpu.memory_space<vmem>>, vector<4x16x128xf32>,
    return
  }
  func.func @transform_0(%arg0: i32) -> (i32, i32, i32) {
    %c0_i32 = arith.constant 0 : i32
    %c0_i32_0 = arith.constant 0 : i32
    %c0_i32_1 = arith.constant 0 : i32
    %c0_i32_2 = arith.constant 0 : i32
    return %c0_i32, %c0_i32_0, %c0_i32_1 : i32, i32, i32
  }
  func.func @transform_1(%arg0: i32) -> (i32, i32, i32) {
    %c0_i32 = arith.constant 0 : i32
    %c0_i32_0 = arith.constant 0 : i32
    %c0_i32_1 = arith.constant 0 : i32
    %c0_i32_2 = arith.constant 0 : i32
    return %c0_i32, %c0_i32_0, %c0_i32_1 : i32, i32, i32
  }
  func.func @transform_2(%arg0: i32) -> (i32, i32, i32) {
    %c0_i32 = arith.constant 0 : i32
    %c0_i32_0 = arith.constant 0 : i32
    %c0_i32_1 = arith.constant 0 : i32
    %c0_i32_2 = arith.constant 0 : i32
    return %c0_i32, %c0_i32_0, %c0_i32_1 : i32, i32, i32
  }
}

</mosaic_0001>

<bundles_post_ra>
// kernel: tpu_custom_call.1
= control target key start
LH: loop header
LB: loop body
LE: loop exit
PB: predicated region body
PF: predicated region fallthrough
CT: control target
= control target key end

     0   :  { %7 = vsyncpa [#allocation3], 0  ;;  %s226_s0 = inlined_call_operand.hbm [shape: f32[4,16,128], index: 0, kind: input, shape index: {}]   ;;  %s227_s1 = inlined_call_operand.hbm [shape: f32[1,16,128], index: 1, kind: input, shape index: {}]   ;;  %s228_s2 = inlined_call_operand.hbm [shape: f32[4,16,128], index: 2, kind: output, shape index: {}]  }
   0x1   :  { %8 = vsyncpa [#allocation6], 0 }
   0x2   :  { %9 = vsyncpa [#allocation4], 0  ;;  %s161_s9 = smov [#allocation2]   ;;  %s89_s13 = scalar_lea.hbm %s226_s0, 1024 }
   0x3   :  { %s15_s10 = sshll.u32 %s161_s9, 4  ;;  %p90_p0 = scmp.ne.s32.totalorder %s226_s0, %s89_s13  ;;  %s16_s10 = int_to_ptr.vmem [resolvable:$true] %s15_s10 }
   0x4   :  { %p93_p1 = scmp.lt.u32.totalorder %s89_s13, %s226_s0 }
   0x6   :  { %p95_p2 = pnand %p93_p1, %p90_p0 }
   0x8   :  { %98 = shalt.err (!%p95_p2)
}
   0x9   :  { %s99_s18 = scalar_lea.vmem %s16_s10, 1024  ;;  %p104_p4 = scmp.lt.s32.totalorder %s16_s10, %s16_s10 }
   0xa   :  { %p100_p3 = scmp.ne.s32.totalorder %s16_s10, %s99_s18  ;;  %p105_p5 = scmp.lt.s32.totalorder %s99_s18, %s99_s18 }
   0xc   :  { %p106_p6 = por %p105_p5, %p104_p4 }
   0xe   :  { %p107_p7 = pnand %p106_p6, %p100_p3 }
  0x10   :  { %110 = shalt.err (!%p107_p7)
}
  0x11   :  { %s162_s19 = smov 128   ;;  %s163_s20 = smov 8  }
  0x12   :  { %21 = dma.hbm_to_vmem [thread:$0]  %s226_s0, 1024, %s16_s10, [#allocation3], %s162_s19, %s162_s19, %s163_s20  }
  0x13   :  { %s164_s23 = smov [#allocation5]   ;;  %s111_s27 = scalar_lea.hbm %s227_s1, 256 }
  0x14   :  { %s27_s24 = sshll.u32 %s164_s23, 4  ;;  %p112_p8 = scmp.ne.s32.totalorder %s227_s1, %s111_s27  ;;  %s28_s24 = int_to_ptr.vmem [resolvable:$true] %s27_s24 }
  0x15   :  { %p115_p9 = scmp.lt.u32.totalorder %s111_s27, %s227_s1 }
  0x17   :  { %p117_p10 = pnand %p115_p9, %p112_p8 }
  0x19   :  { %120 = shalt.err (!%p117_p10)
}
  0x1a   :  { %s121_s4 = scalar_lea.vmem %s28_s24, 256  ;;  %p126_p12 = scmp.lt.s32.totalorder %s28_s24, %s28_s24 }
  0x1b   :  { %p122_p11 = scmp.ne.s32.totalorder %s28_s24, %s121_s4  ;;  %p127_p13 = scmp.lt.s32.totalorder %s121_s4, %s121_s4 }
  0x1d   :  { %p128_p0 = por %p127_p13, %p126_p12 }
  0x1f   :  { %p129_p1 = pnand %p128_p0, %p122_p11 }
  0x21   :  { %132 = shalt.err (!%p129_p1)
}
  0x22   :  { %33 = dma.hbm_to_vmem [thread:$0]  %s227_s1, 256, %s28_s24, [#allocation6], %s162_s19, %s162_s19, %s163_s20  }
  0x23   :  { %155 = dma.done.wait [#allocation3], 1024  }
  0x24   :  { %156 = vsyncadd [#allocation3], 4294966272 }
  0x25   :  { %157 = dma.done.wait [#allocation6], 256  }
  0x26   :  { %158 = vsyncadd [#allocation6], 4294967040  ;;  %v40_v0 = vld [vmem:[#allocation2] sm:$0xff]  ;;  %v41_v2 = vld [vmem:[#allocation2 + $0x8] sm:$0xff]  ;;  %s165_s6 = smov [#allocation7]  }
  0x27   :  { %v48_v1 = vld [vmem:[#allocation5] sm:$0xff]  ;;  %v49_v4 = vld [vmem:[#allocation5 + $0x8] sm:$0xff]  ;;  %v42_v5 = vld [vmem:[#allocation2 + $0x10] sm:$0xff]  ;;  %s71_s7 = sshll.u32 %s165_s6, 4  ;;  %s72_s7 = int_to_ptr.vmem [resolvable:$true] %s71_s7 }
  0x28   :  { %v50_v3 = vadd.f32 %v48_v1, %v40_v0  ;;  %v43_v6 = vld [vmem:[#allocation2 + $0x18] sm:$0xff]  ;;  %v51_v7 = vadd.f32 %v49_v4, %v41_v2  ;;  %v52_v8 = vadd.f32 %v48_v1, %v42_v5  ;;  %v44_v10 = vld [vmem:[#allocation2 + $0x20] sm:$0xff]  ;;  %v45_v11 = vld [vmem:[#allocation2 + $0x28] sm:$0xff]  ;;  %s133_s1 = scalar_lea.vmem %s72_s7, 1024  ;;  %p138_p3 = scmp.lt.s32.totalorder %s72_s7, %s72_s7 }
  0x29   :  { %v53_v9 = vadd.f32 %v49_v4, %v43_v6  ;;  %v46_v12 = vld [vmem:[#allocation2 + $0x30] sm:$0xff]  ;;  %v54_v13 = vadd.f32 %v48_v1, %v44_v10  ;;  %v55_v14 = vadd.f32 %v49_v4, %v45_v11  ;;  %v47_v16 = vld [vmem:[#allocation2 + $0x38] sm:$0xff]  ;;  %p134_p2 = scmp.ne.s32.totalorder %s72_s7, %s133_s1  ;;  %p139_p4 = scmp.lt.s32.totalorder %s133_s1, %s133_s1 }
  0x2a   :  { %58 = vst [vmem:[#allocation7] sm:$0xff] %v50_v3  ;;  %v56_v15 = vadd.f32 %v48_v1, %v46_v12  ;;  %59 = vst [vmem:[#allocation7 + $0x8] sm:$0xff] %v51_v7  ;;  %v57_v17 = vadd.f32 %v49_v4, %v47_v16 }
  0x2b   :  { %60 = vst [vmem:[#allocation7 + $0x10] sm:$0xff] %v52_v8  ;;  %61 = vst [vmem:[#allocation7 + $0x18] sm:$0xff] %v53_v9  ;;  %p140_p5 = por %p139_p4, %p138_p3 }
  0x2c   :  { %62 = vst [vmem:[#allocation7 + $0x20] sm:$0xff] %v54_v13  ;;  %63 = vst [vmem:[#allocation7 + $0x28] sm:$0xff] %v55_v14 }
  0x2d   :  { %64 = vst [vmem:[#allocation7 + $0x30] sm:$0xff] %v56_v15  ;;  %65 = vst [vmem:[#allocation7 + $0x38] sm:$0xff] %v57_v17  ;;  %p141_p6 = pnand %p140_p5, %p134_p2 }
  0x2f   :  { %144 = shalt.err (!%p141_p6)
}
  0x30   :  { %s145_s10 = scalar_lea.hbm %s228_s2, 1024 }
  0x31   :  { %p146_p7 = scmp.ne.s32.totalorder %s228_s2, %s145_s10  ;;  %p149_p8 = scmp.lt.u32.totalorder %s145_s10, %s228_s2 }
  0x33   :  { %p151_p9 = pnand %p149_p8, %p146_p7 }
  0x35   :  { %154 = shalt.err (!%p151_p9)
}
  0x36   :  { %77 = dma.vmem_to_hbm [thread:$0]  %s72_s7, 1024, %s228_s2, [#allocation4], %s162_s19, %s162_s19, %s163_s20  }
  0x37   :  { %159 = dma.done.wait [#allocation4], 1024  }
  0x38   :  { %160 = vsyncadd [#allocation4], 4294966272 }
  0x39   :  { %81 = vsyncpa [#allocation3], 1 }
  0x3a   :  { %82 = vsyncpa [#allocation6], 1 }
  0x3b   :  { %83 = vsyncpa [#allocation4], 1 }

</bundles_post_ra>
